<compile_context>
chip_gen: v7x
topology: tpu7x:2x2x1
jax: 0.10.0
libtpu: 0.0.40
codegen_flags: <defaults>
</compile_context>

<pallas_src>
import jax
import jax.numpy as jnp
from jax.experimental import pallas as pl
from jax.experimental.pallas import tpu as pltpu


def _round_up(n, m):
    return ((n + m - 1) // m) * m


def ddqn_kernel(x_ref, w1_ref, b1_ref, w2_ref, b2_ref, w3_ref, b3_ref, out_ref):
    # Feature-major layout (batch on the lane axis):
    #   x:   (S, TB)       w1: (H, S)      b1: (H, 1)
    #   h1:  (H, TB)       w2: (H, H)      b2: (H, 1)
    #   h2:  (H, TB)       w3: (A_pad, H)  b3: (A_pad, 1)
    #   out: (A_pad, TB)
    x = x_ref[...]
    h1 = jnp.dot(w1_ref[...], x, preferred_element_type=jnp.float32) + b1_ref[...]
    h1 = jnp.maximum(h1, 0.0)                              # relu(head_1(input))
    h2 = jnp.dot(w2_ref[...], h1, preferred_element_type=jnp.float32) + b2_ref[...]
    h2 = jnp.maximum(h2, 0.0)                              # relu(ff_1(x))
    out = jnp.dot(w3_ref[...], h2, preferred_element_type=jnp.float32) + b3_ref[...]
    out_ref[...] = out.astype(out_ref.dtype)               # ff_2(x), no activation


def prepare_params(w1, b1, w2, b2, w3, b3):
    """One-time layout prep (call once at init, not per forward step).

    Transposes weights to (out, in), reshapes biases to (out, 1) columns, and
    zero-pads ff_2's output features up to a multiple of 8 sublanes so the
    kernel's output block is (8, TB) — lane-dense stores with no 128-lane
    write amplification. Zero-padded rows are exact and sliced off later.
    """
    A = w3.shape[1]
    A_pad = _round_up(A, 8)
    w3t = jnp.pad(jnp.transpose(w3), ((0, A_pad - A), (0, 0)))
    b3t = jnp.pad(jnp.reshape(b3, (-1, 1)), ((0, A_pad - A), (0, 0)))
    return {
        "w1": jnp.transpose(w1), "b1": jnp.reshape(b1, (-1, 1)),
        "w2": jnp.transpose(w2), "b2": jnp.reshape(b2, (-1, 1)),
        "w3": w3t, "b3": b3t,
        "action_size": A,
    }


def ddqn_forward(x, params, *, max_batch_tile=4096):
    """x: (B, S) float32. Returns (B, A) float32."""
    B, S = x.shape
    w1, b1 = params["w1"], params["b1"]
    w2, b2 = params["w2"], params["b2"]
    w3, b3 = params["w3"], params["b3"]
    A = params["action_size"]
    H = w1.shape[0]
    A_pad = w3.shape[0]

    # Balanced batch tiling. Batch rides the lane axis so TB is a multiple of
    # 128. One tile whenever B fits; otherwise an even number of near-equal
    # tiles so the parallel axis load-balances across v7x's two TensorCores.
    if B <= max_batch_tile:
        num_tiles = 1
    else:
        num_tiles = 2 * pl.cdiv(B, 2 * max_batch_tile)
    TB = _round_up(pl.cdiv(B, num_tiles), 128)
    B_pad = num_tiles * TB

    # Feature-major input (S, B_pad); zero-padded batch columns are exact and
    # sliced off below.
    xt = jnp.pad(jnp.transpose(x), ((0, 0), (0, B_pad - B)))

    def const_spec(shape):
        # Same block every grid step -> weights/biases stay resident in VMEM.
        return pl.BlockSpec(shape, lambda i: (0,) * len(shape))

    out_t = pl.pallas_call(
        ddqn_kernel,
        out_shape=jax.ShapeDtypeStruct((A_pad, B_pad), jnp.float32),
        grid=(num_tiles,),
        in_specs=[
            pl.BlockSpec((S, TB), lambda i: (0, i)),   # x: streamed over batch
            const_spec((H, S)),                        # w1
            const_spec((H, 1)),                        # b1
            const_spec((H, H)),                        # w2
            const_spec((H, 1)),                        # b2
            const_spec((A_pad, H)),                    # w3 (sublane-padded)
            const_spec((A_pad, 1)),                    # b3 (sublane-padded)
        ],
        out_specs=pl.BlockSpec((A_pad, TB), lambda i: (0, i)),
        compiler_params=pltpu.CompilerParams(
            dimension_semantics=("parallel",),         # megacore split on v7x
        ),
    )(xt, w1, b1, w2, b2, w3, b3)

    return jnp.transpose(out_t[:A, :B])


def init_linear(key, fan_in, fan_out):
    """Deterministic init mimicking nn.Linear's uniform(-1/sqrt(fan_in), +)."""
    kw, kb = jax.random.split(key)
    bound = 1.0 / jnp.sqrt(jnp.float32(fan_in))
    w = jax.random.uniform(kw, (fan_in, fan_out), jnp.float32, -bound, bound)
    b = jax.random.uniform(kb, (fan_out,), jnp.float32, -bound, bound)
    return w, b


def reference_forward(x, w1, b1, w2, b2, w3, b3):
    h1 = jnp.maximum(x @ w1 + b1, 0.0)
    h2 = jnp.maximum(h1 @ w2 + b2, 0.0)
    return h2 @ w3 + b3


if __name__ == "__main__":
    # DDQN(state_size=(8,), action_size=4, layer_size=32), batch=2
    state_size = 8
    action_size = 4
    layer_size = 32
    batch = 2

    key = jax.random.PRNGKey(0)
    kx, k1, k2, k3, kx2, kx3 = jax.random.split(key, 6)

    x = jax.random.normal(kx, (batch, state_size), jnp.float32)
    w1, b1 = init_linear(k1, state_size, layer_size)    # head_1
    w2, b2 = init_linear(k2, layer_size, layer_size)    # ff_1
    w3, b3 = init_linear(k3, layer_size, action_size)   # ff_2

    params = prepare_params(w1, b1, w2, b2, w3, b3)      # one-time layout prep

    out = ddqn_forward(x, params)
    out = jax.block_until_ready(out)
    ref = reference_forward(x, w1, b1, w2, b2, w3, b3)
    assert out.shape == (batch, action_size)
    assert jnp.allclose(out, ref, atol=1e-5, rtol=1e-5), "mismatch vs reference"

    # Secondary check: single-tile path with batch padding (B=528 -> TB=640).
    big_batch = 528
    xb = jax.random.normal(kx2, (big_batch, state_size), jnp.float32)
    out_big = jax.block_until_ready(ddqn_forward(xb, params))
    ref_big = reference_forward(xb, w1, b1, w2, b2, w3, b3)
    assert out_big.shape == (big_batch, action_size)
    assert jnp.allclose(out_big, ref_big, atol=1e-4, rtol=1e-4), "mismatch (padded)"

    # Tertiary check: multi-step grid (even tile count) with a small tile cap.
    huge_batch = 1000
    xh = jax.random.normal(kx3, (huge_batch, state_size), jnp.float32)
    out_huge = jax.block_until_ready(ddqn_forward(xh, params, max_batch_tile=256))
    ref_huge = reference_forward(xh, w1, b1, w2, b2, w3, b3)
    assert out_huge.shape == (huge_batch, action_size)
    assert jnp.allclose(out_huge, ref_huge, atol=1e-4, rtol=1e-4), "mismatch (tiled)"

    print("KERNEL_OK")
</pallas_src>

<mosaic_0001>
module attributes {stable_mosaic.version = 11 : i64} {
  func.func @ddqn_kernel(%arg0: i32, %arg1: memref<8x128xf32, #tpu.memory_space<vmem>>, %arg2: memref<32x8xf32, #tpu.memory_space<vmem>>, %arg3: memref<32x1xf32, #tpu.memory_space<vmem>>, %arg4: memref<32x32xf32, #tpu.memory_space<vmem>>, %arg5: memref<32x1xf32, #tpu.memory_space<vmem>>, %arg6: memref<8x32xf32, #tpu.memory_space<vmem>>, %arg7: memref<8x1xf32, #tpu.memory_space<vmem>>, %arg8: memref<8x128xf32, #tpu.memory_space<vmem>>) attributes {dimension_semantics = [#tpu.dimension_semantics<parallel>], iteration_bounds = array<i64: 1>, scalar_prefetch = 0 : i64, scratch_operands = 0 : i64, tpu.core_type = #tpu.core_type<tc>, window_params = [{transform_indices = @transform_0, window_bounds = array<i64: 8, 128>}, {pipeline_mode = #tpu.pipeline_mode<synchronous>, transform_indices = @transform_1, window_bounds = array<i64: 32, 8>}, {pipeline_mode = #tpu.pipeline_mode<synchronous>, transform_indices = @transform_2, window_bounds = array<i64: 32, 1>}, {pipeline_mode = #tpu.pipeline_mode<synchronous>, transform_indices = @transform_3, window_bounds = array<i64: 32, 32>}, {pipeline_mode = #tpu.pipeline_mode<synchronous>, transform_indices = @transform_4, window_bounds = array<i64: 32, 1>}, {pipeline_mode = #tpu.pipeline_mode<synchronous>, transform_indices = @transform_5, window_bounds = array<i64: 8, 32>}, {pipeline_mode = #tpu.pipeline_mode<synchronous>, transform_indices = @transform_6, window_bounds = array<i64: 8, 1>}, {transform_indices = @transform_7, window_bounds = array<i64: 8, 128>}]} {
    %c0 = arith.constant 0 : index
    %c0_0 = arith.constant 0 : index
    %0 = vector.load %arg1[%c0, %c0_0] : memref<8x128xf32, #tpu.memory_space<vmem>>, vector<8x128xf32>
    %c0_1 = arith.constant 0 : index
    %c0_2 = arith.constant 0 : index
    %1 = vector.load %arg2[%c0_1, %c0_2] : memref<32x8xf32, #tpu.memory_space<vmem>>, vector<32x8xf32>
    %cst = arith.constant dense<0.000000e+00> : vector<32x128xf32>
    %2 = tpu.matmul %1, %0, %cst {dimension_numbers = #tpu.dot_dimension_numbers<[1], [0], [0], [1], [0, 0, 1, 1], [], []>} : vector<32x8xf32>, vector<8x128xf32>, vector<32x128xf32> -> vector<32x128xf32>
    %c0_3 = arith.constant 0 : index
    %c0_4 = arith.constant 0 : index
    %3 = vector.load %arg3[%c0_3, %c0_4] : memref<32x1xf32, #tpu.memory_space<vmem>>, vector<32x1xf32>
    %4 = vector.broadcast %3 : vector<32x1xf32> to vector<32x128xf32>
    %5 = arith.addf %2, %4 : vector<32x128xf32>
    %cst_5 = arith.constant 0.000000e+00 : f32
    %6 = vector.broadcast %cst_5 : f32 to vector<32x128xf32>
    %7 = arith.maximumf %5, %6 : vector<32x128xf32>
    %c0_6 = arith.constant 0 : index
    %c0_7 = arith.constant 0 : index
    %8 = vector.load %arg4[%c0_6, %c0_7] : memref<32x32xf32, #tpu.memory_space<vmem>>, vector<32x32xf32>
    %cst_8 = arith.constant dense<0.000000e+00> : vector<32x128xf32>
    %9 = tpu.matmul %8, %7, %cst_8 {dimension_numbers = #tpu.dot_dimension_numbers<[1], [0], [0], [1], [0, 0, 1, 1], [], []>} : vector<32x32xf32>, vector<32x128xf32>, vector<32x128xf32> -> vector<32x128xf32>
    %c0_9 = arith.constant 0 : index
    %c0_10 = arith.constant 0 : index
    %10 = vector.load %arg5[%c0_9, %c0_10] : memref<32x1xf32, #tpu.memory_space<vmem>>, vector<32x1xf32>
    %11 = vector.broadcast %10 : vector<32x1xf32> to vector<32x128xf32>
    %12 = arith.addf %9, %11 : vector<32x128xf32>
    %cst_11 = arith.constant 0.000000e+00 : f32
    %13 = vector.broadcast %cst_11 : f32 to vector<32x128xf32>
    %14 = arith.maximumf %12, %13 : vector<32x128xf32>
    %c0_12 = arith.constant 0 : index
    %c0_13 = arith.constant 0 : index
    %15 = vector.load %arg6[%c0_12, %c0_13] : memref<8x32xf32, #tpu.memory_space<vmem>>, vector<8x32xf32>
    %cst_14 = arith.constant dense<0.000000e+00> : vector<8x128xf32>
    %16 = tpu.matmul %15, %14, %cst_14 {dimension_numbers = #tpu.dot_dimension_numbers<[1], [0], [0], [1], [0, 0, 1, 1], [], []>} : vector<8x32xf32>, vector<32x128xf32>, vector<8x128xf32> -> vector<8x128xf32>
    %c0_15 = arith.constant 0 : index
    %c0_16 = arith.constant 0 : index
    %17 = vector.load %arg7[%c0_15, %c0_16] : memref<8x1xf32, #tpu.memory_space<vmem>>, vector<8x1xf32>
    %18 = vector.broadcast %17 : vector<8x1xf32> to vector<8x128xf32>
    %19 = arith.addf %16, %18 : vector<8x128xf32>
    %c0_17 = arith.constant 0 : index
    %c0_18 = arith.constant 0 : index
    %20 = vector.load %arg8[%c0_17, %c0_18] : memref<8x128xf32, #tpu.memory_space<vmem>>, vector<8x128xf32>
    tpu.vector_store %arg8[%c0_17, %c0_18], %19 {strides = array<i32>} : memref<8x128xf32, #tpu.memory_space<vmem>>, vector<8x128xf32>,
    return
  }
  func.func @transform_0(%arg0: i32) -> (i32, i32) {
    %c0_i32 = arith.constant 0 : i32
    %c0_i32_0 = arith.constant 0 : i32
    return %c0_i32, %arg0 : i32, i32
  }
  func.func @transform_1(%arg0: i32) -> (i32, i32) {
    %c0_i32 = arith.constant 0 : i32
    %c0_i32_0 = arith.constant 0 : i32
    %c0_i32_1 = arith.constant 0 : i32
    return %c0_i32, %c0_i32_0 : i32, i32
  }
  func.func @transform_2(%arg0: i32) -> (i32, i32) {
    %c0_i32 = arith.constant 0 : i32
    %c0_i32_0 = arith.constant 0 : i32
    %c0_i32_1 = arith.constant 0 : i32
    return %c0_i32, %c0_i32_0 : i32, i32
  }
  func.func @transform_3(%arg0: i32) -> (i32, i32) {
    %c0_i32 = arith.constant 0 : i32
    %c0_i32_0 = arith.constant 0 : i32
    %c0_i32_1 = arith.constant 0 : i32
    return %c0_i32, %c0_i32_0 : i32, i32
  }
  func.func @transform_4(%arg0: i32) -> (i32, i32) {
    %c0_i32 = arith.constant 0 : i32
    %c0_i32_0 = arith.constant 0 : i32
    %c0_i32_1 = arith.constant 0 : i32
    return %c0_i32, %c0_i32_0 : i32, i32
  }
  func.func @transform_5(%arg0: i32) -> (i32, i32) {
    %c0_i32 = arith.constant 0 : i32
    %c0_i32_0 = arith.constant 0 : i32
    %c0_i32_1 = arith.constant 0 : i32
    return %c0_i32, %c0_i32_0 : i32, i32
  }
  func.func @transform_6(%arg0: i32) -> (i32, i32) {
    %c0_i32 = arith.constant 0 : i32
    %c0_i32_0 = arith.constant 0 : i32
    %c0_i32_1 = arith.constant 0 : i32
    return %c0_i32, %c0_i32_0 : i32, i32
  }
  func.func @transform_7(%arg0: i32) -> (i32, i32) {
    %c0_i32 = arith.constant 0 : i32
    %c0_i32_0 = arith.constant 0 : i32
    return %c0_i32, %arg0 : i32, i32
  }
}

</mosaic_0001>

<bundles_post_ra>
// kernel: tpu_custom_call.1
= control target key start
LH: loop header
LB: loop body
LE: loop exit
PB: predicated region body
PF: predicated region fallthrough
CT: control target
= control target key end

     0   :  { %vm56_vm0 = vcmask 64512   ;;  %v488_v5 = vmov 0   ;;  %s611_s0 = inlined_call_operand.vmem [shape: f32[8,128], index: 0, kind: input, shape index: {}]   ;;  %s612_s1 = inlined_call_operand.vmem [shape: f32[32,8], index: 1, kind: input, shape index: {}]   ;;  %s613_s2 = inlined_call_operand.vmem [shape: f32[32,1], index: 2, kind: input, shape index: {}]   ;;  %s614_s3 = inlined_call_operand.vmem [shape: f32[32,32], index: 3, kind: input, shape index: {}]   ;;  %s615_s4 = inlined_call_operand.vmem [shape: f32[32,1], index: 4, kind: input, shape index: {}]   ;;  %s616_s5 = inlined_call_operand.vmem [shape: f32[8,32], index: 5, kind: input, shape index: {}]   ;;  %s617_s6 = inlined_call_operand.vmem [shape: f32[8,1], index: 6, kind: input, shape index: {}]   ;;  %s618_s7 = inlined_call_operand.hbm [shape: f32[8,128], index: 7, kind: output, shape index: {}]  }
   0x1   :  { %v27_v0 = vld [vmem:[%s611_s0] sm:$0xff]  ;;  %v29_v2 = vld [vmem:[%s612_s1 + $0x8] sm:$0xff]  ;;  %v30_v3 = vld [vmem:[%s612_s1 + $0x10] sm:$0xff]  ;;  %462 = vset.pattern.permute.xlu0 %v488_v5  ;;  %463 = vset.pattern.permute.xlu1 %v488_v5 }
   0x2   :  { %v28_v1 = vld [vmem:[%s612_s1] sm:$0xff]  ;;  %410 = vmatprep.subr.mxu0 %v27_v0  ;;  %v34_v6 = vld [vmem:[%s613_s2 + $0x10] sm:$0xff]  ;;  %v31_v7 = vld [vmem:[%s612_s1 + $0x18] sm:$0xff] }
   0x3   :  { %412 = vmatprep.mubr.msk.f32.mxu0 %vm56_vm0, %v28_v1  ;;  %v32_v4 = vld [vmem:[%s613_s2] sm:$0xff]  ;;  %411 = vmatpush3.msra.mxu0 %v27_v0  ;;  %v33_v8 = vld [vmem:[%s613_s2 + $0x8] sm:$0xff] }
   0x4   :  { %413 = vmatmul.mubr.msk.f32.vlgmr.msra.gmra.mrb[0].mxu0 %vm56_vm0, %v29_v2  ;;  %38 = vperm.xlu0 %462, %v32_v4  }
   0x5   :  { %415 = vmatprep.mubr.msk.f32.mxu0 %vm56_vm0, %v30_v3 }
   0x6   :  { %12 = vsyncpa [#allocation3], 0  ;;  %48 = vperm.xlu1 %463, %v34_v6   ;;  %v35_v9 = vld [vmem:[%s613_s2 + $0x18] sm:$0xff]  ;;  %v162_v10 = vld [vmem:[%s615_s4] sm:$0xff]  ;;  %vm186_vm1 = vcmask 261120   ;;  %v489_v37 = vmov 0.0|0.0  }
   0x7   :  { %v163_v11 = vld [vmem:[%s615_s4 + $0x8] sm:$0xff]  ;;  %v164_v12 = vld [vmem:[%s615_s4 + $0x10] sm:$0xff]  ;;  %v165_v13 = vld [vmem:[%s615_s4 + $0x18] sm:$0xff]  ;;  %451 = vmatprep.subr.bf16.mxu0 %v489_v37  ;;  %vm490_vm2 = vmmov 0   ;;  %v491_v38 = vmov 0.0   ;;  %s492_s10 = smov [#allocation2]  }
   0x8   :  { %416 = vmatmul.mubr.msk.f32.gmra.mrb[2].mxu0 %vm56_vm0, %v31_v7  ;;  %43 = vperm.xlu0 %462, %v33_v8   ;;  %v289_v14 = vld [vmem:[%s617_s6] sm:$0xff]  ;;  %v159_v34 = vld [vmem:[%s614_s3 + $0x8] sm:$0xff]  ;;  %v160_v35 = vld [vmem:[%s614_s3 + $0x10] sm:$0xff]  ;;  %s375_s0 = sshll.u32 %s492_s10, 4  ;;  %s376_s0 = int_to_ptr.vmem [resolvable:$true] %s375_s0 }
   0x9   :  { %v158_v15 = vld [vmem:[%s614_s3] sm:$0xff]  ;;  %v161_v36 = vld [vmem:[%s614_s3 + $0x18] sm:$0xff]  ;;  %440 = vmatprep.mubr.msk.f32.mxu0 %vm490_vm2, %v491_v38  ;;  %s464_s11 = scalar_lea.vmem %s376_s0, 128  ;;  %p469_p1 = scmp.lt.s32.totalorder %s376_s0, %s376_s0 }
   0xa   :  { %53 = vperm.xlu1 %463, %v35_v9   ;;  %426 = vmatprep.mubr.msk.f32.mxu1 %vm186_vm1, %v158_v15  ;;  %v288_v57 = vld [vmem:[%s616_s5] sm:$0xff]  ;;  %p465_p0 = scmp.ne.s32.totalorder %s376_s0, %s464_s11  ;;  %p470_p2 = scmp.lt.s32.totalorder %s464_s11, %s464_s11 }
   0xc   :  { %168 = vperm.xlu0 %462, %v162_v10   ;;  %p471_p3 = por %p470_p2, %p469_p1 }
   0xe   :  { %173 = vperm.xlu1 %463, %v163_v11   ;;  %p472_p4 = pnand %p471_p3, %p465_p0 }
  0x10   :  { %178 = vperm.xlu0 %462, %v164_v12  }
  0x12   :  { %183 = vperm.xlu1 %463, %v165_v13  }
  0x14   :  { %292 = vperm.xlu0 %462, %v289_v14  }
  0x83   :  { %v39_v16 = vpop.permute.xlu0 %38 }
  0x85   :  { %v49_v17 = vpop.permute.xlu1 %48 }
  0x87   :  { %v44_v18 = vpop.permute.xlu0 %43 }
  0x89   :  { %v54_v24 = vpop.permute.xlu1 %53 }
  0x8b   :  { %v169_v40 = vpop.permute.xlu0 %168 }
  0x8d   :  { %v174_v39 = vpop.permute.xlu1 %173 }
  0x8f   :  { %v179_v49 = vpop.permute.xlu0 %178 }
  0x91   :  { %v184_v46 = vpop.permute.xlu1 %183 }
  0x93   :  { %v293_v58 = vpop.permute.xlu0 %292 }
  0xd7   :  { %v414_v19 = vpop.f32.mrb[0].mxu0 }
  0xd8   :  { %v141_v20 = vadd.f32 %v414_v19, %v44_v18  ;;  %v135_v21 = vpop.f32.mrb[1].mxu0 }
  0xd9   :  { %v136_v22 = vadd.f32 %v135_v21, %v39_v16 }
  0xda   :  { %v155_v23 = vmax.f32 %v141_v20, 0.0 }
  0xdb   :  { %v154_v25 = vmax.f32 %v136_v22, 0.0  ;;  %v417_v26 = vpop.f32.mrb[2].mxu0 }
  0xdc   :  { %v151_v27 = vadd.f32 %v417_v26, %v54_v24  ;;  %v145_v28 = vpop.f32.mrb[3].mxu0 }
  0xdd   :  { %v146_v29 = vadd.f32 %v145_v28, %v49_v17  ;;  %v443_v30 = vpack.c.bf16 %v155_v23, %v154_v25 }
  0xde   :  { %v157_v31 = vmax.f32 %v151_v27, 0.0 }
  0xdf   :  { %v156_v32 = vmax.f32 %v146_v29, 0.0  ;;  %444 = vmatprep.subr.bf16.mxu1 %v443_v30 }
  0xe0   :  { %446 = vmatpush3.bf16.msra.mxu1 %v443_v30 }
  0xe1   :  { %v447_v33 = vpack.c.bf16 %v157_v31, %v156_v32 }
  0xe3   :  { %448 = vmatprep.subr.bf16.mxu1 %v447_v33 }
  0xe4   :  { %450 = vmatpush3.bf16.msra.mxu1 %v447_v33 }
  0xe7   :  { %427 = vmatmul.mubr.msk.f32.vlgmr.msra.gmra.mrb[0].mxu1 %vm186_vm1, %v159_v34 }
  0xe8   :  { %429 = vmatprep.mubr.msk.f32.mxu1 %vm186_vm1, %v160_v35 }
  0xeb   :  { %430 = vmatmul.mubr.msk.f32.gmra.mrb[2].mxu1 %vm186_vm1, %v161_v36 }
 0x1ba   :  { %v428_v41 = vpop.f32.mrb[0].mxu1 }
 0x1bb   :  { %v271_v42 = vadd.f32 %v428_v41, %v174_v39  ;;  %v265_v43 = vpop.f32.mrb[1].mxu1 }
 0x1bc   :  { %v266_v44 = vadd.f32 %v265_v43, %v169_v40 }
 0x1bd   :  { %v285_v45 = vmax.f32 %v271_v42, 0.0 }
 0x1be   :  { %v284_v47 = vmax.f32 %v266_v44, 0.0  ;;  %v431_v48 = vpop.f32.mrb[2].mxu1 }
 0x1bf   :  { %v281_v50 = vadd.f32 %v431_v48, %v184_v46  ;;  %v275_v51 = vpop.f32.mrb[3].mxu1 }
 0x1c0   :  { %v452_v52 = vpack.c.bf16 %v285_v45, %v284_v47  ;;  %v276_v53 = vadd.f32 %v275_v51, %v179_v49 }
 0x1c1   :  { %v287_v54 = vmax.f32 %v281_v50, 0.0 }
 0x1c2   :  { %v286_v55 = vmax.f32 %v276_v53, 0.0  ;;  %453 = vmatpush3.bf16.msra.mxu0 %v452_v52 }
 0x1c3   :  { %454 = vmatprep.subr.bf16.mxu0 %v489_v37 }
 0x1c4   :  { %v455_v56 = vpack.c.bf16 %v287_v54, %v286_v55 }
 0x1c6   :  { %456 = vmatpush3.bf16.msra.mxu0 %v455_v56 }
 0x1c9   :  { %441 = vmatmul.mubr.msk.f32.vlgmr.msra.gmra.mrb[4].mxu0 %vm186_vm1, %v288_v57 }
 0x29c   :  { %v364_v59 = vpop.f32.mrb[4].mxu0 }
 0x29d   :  { %v365_v60 = vadd.f32 %v364_v59, %v293_v58  ;;  %v442_v61 = vpop.f32.mrb[5].mxu0 }
 0x29f   :  { %368 = vst [vmem:[#allocation2] sm:$0xff] %v365_v60 }
 0x2a0   :  { %475 = shalt.err (!%p472_p4)
}
 0x2a1   :  { %s476_s5 = scalar_lea.hbm %s618_s7, 128 }
 0x2a2   :  { %p477_p5 = scmp.ne.s32.totalorder %s618_s7, %s476_s5  ;;  %p480_p6 = scmp.lt.u32.totalorder %s476_s5, %s618_s7 }
 0x2a4   :  { %p482_p7 = pnand %p480_p6, %p477_p5 }
 0x2a6   :  { %485 = shalt.err (!%p482_p7)
}
 0x2a7   :  { %378 = dma.vmem_to_hbm [thread:$0]  %s376_s0, 128, %s618_s7, [#allocation3]  }
 0x2a8   :  { %486 = dma.done.wait [#allocation3], 128  }
 0x2a9   :  { %487 = vsyncadd [#allocation3], 4294967168 }
 0x2aa   :  { %382 = vsyncpa [#allocation3], 1 }

</bundles_post_ra>
